<compile_context>
chip_gen: v5e
topology: v5e:2x2
jax: 0.10.0
libtpu: 0.0.40
codegen_flags: <defaults>
</compile_context>

<pallas_src>
import numpy as np
import jax
import jax.numpy as jnp
from jax.experimental import pallas as pl
from jax.experimental.pallas import tpu as pltpu

NUM_PLANE = 7
HID = 32
HID_PAD = 512          # fused hidden width (2*7*32 + 1 = 449, padded to a 128 multiple)


# ----------------------------------------------------------------------------- kernel
def _base_model1_kernel(pts_ref, w_aux_ref, w1_ref, w2_ref,
                        dist_one_ref, belongs_ref, xproj_ref, yproj_ref, roi_ref):
    P = NUM_PLANE
    pts = pts_ref[...]                                                    # [4, TN]

    # projections + signed plane distances (rows 0..6 / 8..14 / 16..22 of a [24, TN] slab)
    aux = jnp.dot(w_aux_ref[...], pts, preferred_element_type=jnp.float32)      # [24, TN]
    x_proj = aux[0:P, :]                                                  # [P, TN]
    y_proj = aux[8:8 + P, :]                                              # [P, TN]
    dist = jnp.abs(aux[16:16 + P, :])                                     # [P, TN]

    # fused first layer of (per-plane ROI MLPs + plane-belonging MLP), biases folded
    hidden = jnp.maximum(
        jnp.dot(w1_ref[...], pts, preferred_element_type=jnp.float32), 0.0)     # [512, TN]
    # fused second layer: rows 0..6 = ROI distance, rows 8..14 = belonging logits
    out2 = jnp.dot(w2_ref[...], hidden, preferred_element_type=jnp.float32)     # [16, TN]
    roi = out2[0:P, :]                                                    # [P, TN]
    logits = out2[8:8 + P, :]                                             # [P, TN]

    true_dist = jnp.sqrt(roi * roi + dist * dist)                         # [P, TN]
    # torch: gather(true_distance, 2, argmax(true_distance, 2)) == max over planes
    dist_one_ref[...] = jnp.max(true_dist, axis=0, keepdims=True)         # [1, TN]

    # softmax over the (sublane) plane axis
    m = jnp.max(logits, axis=0, keepdims=True)
    e = jnp.exp(logits - m)
    inv = pl.reciprocal(jnp.sum(e, axis=0, keepdims=True), approx=False)
    belongs_ref[...] = e * inv                                            # [P, TN]

    xproj_ref[...] = x_proj
    yproj_ref[...] = y_proj
    roi_ref[...] = roi


# ------------------------------------------------------------------- wrapper-side glue
def _compute_plane_m(params):
    # z_vector -> to_parameters MLP (tiny, plain JAX glue)
    z = params["z"]                                                       # [1, 128]
    h = jnp.maximum(z @ params["p_w1"] + params["p_b1"], 0.0)             # [1, P*32]
    polar = (h @ params["p_w2"] + params["p_b2"]).reshape(1, NUM_PLANE, 2)
    rho = polar[:, :, 0] * 2.0 * jnp.pi
    a = jnp.cos(rho)
    b = jnp.sin(rho)
    c = -polar[:, :, 1]
    return jnp.stack([a, b, c], axis=1)                                   # [1, 3, P]


def _fold_weights(params):
    """Fold plane params + MLP weights into three lane-friendly matmul slabs.

    Input vector per point is homogeneous: (x, y, z, 1).  The signed plane distance uses
    the true z coordinate (c*z), while the projection constants and all layer-1 biases
    ride on the constant-1 row, exactly matching the PyTorch forward.
    """
    P, H = NUM_PLANE, HID
    plane_m = _compute_plane_m(params)                                    # [1, 3, P]
    a, b, c = plane_m[0, 0], plane_m[0, 1], plane_m[0, 2]                 # each [P]
    zeros_p = jnp.zeros_like(a)

    # x_proj = b(bx - ay) - ac ; y_proj = a(-bx + ay) - bc ; dist = |ax + by + cz|
    m_x = jnp.stack([b * b, -a * b, zeros_p, -a * c], axis=1)             # [P, 4]
    m_y = jnp.stack([-a * b, a * a, zeros_p, -b * c], axis=1)             # [P, 4]
    m_d = jnp.stack([a, b, c, zeros_p], axis=1)                           # [P, 4]

    def pad8(m):
        return jnp.concatenate([m, jnp.zeros((8 - P, 4), jnp.float32)], axis=0)

    w_aux = jnp.concatenate([pad8(m_x), pad8(m_y), pad8(m_d)], axis=0)    # [24, 4]

    # --- fused first layer:  hidden = relu(W1 @ (x, y, z, 1)) ---
    w1x = params["roi_w1"][:, 0, :]                                       # [P, H]
    w1y = params["roi_w1"][:, 1, :]                                       # [P, H]
    w1_roi = (w1x[:, :, None] * m_x[:, None, :] +
              w1y[:, :, None] * m_y[:, None, :])                          # [P, H, 4]
    w1_roi = w1_roi.at[:, :, 3].add(params["roi_b1"])                     # fold L1 bias
    w1_roi = w1_roi.reshape(P * H, 4)

    w1_bel = jnp.stack([params["bel_w1"][0], params["bel_w1"][1],
                        jnp.zeros((P * H,), jnp.float32),
                        params["bel_b1"][0]], axis=1)                     # [P*H, 4]
    ones_row = jnp.array([[0.0, 0.0, 0.0, 1.0]], jnp.float32)             # const-1 hidden row
    w1_fold = jnp.concatenate(
        [w1_roi, w1_bel, ones_row,
         jnp.zeros((HID_PAD - 2 * P * H - 1, 4), jnp.float32)], axis=0)   # [512, 4]

    # --- fused second layer: rows 0..6 ROI, rows 8..14 belonging logits ---
    roi_bd = (jnp.eye(P, dtype=jnp.float32)[:, :, None] *
              params["roi_w2"][None, :, :]).reshape(P, P * H)             # block-diagonal
    w2_fold = jnp.zeros((16, HID_PAD), jnp.float32)
    w2_fold = w2_fold.at[0:P, 0:P * H].set(roi_bd)
    w2_fold = w2_fold.at[0:P, 2 * P * H].set(params["roi_b2"][0])
    w2_fold = w2_fold.at[8:8 + P, P * H:2 * P * H].set(params["bel_w2"].T)
    w2_fold = w2_fold.at[8:8 + P, 2 * P * H].set(params["bel_b2"][0])
    return plane_m, w_aux, w1_fold, w2_fold


def base_model1_forward(points, params, *, tile_n=1024):
    B, N, _ = points.shape
    P = NUM_PLANE
    total = B * N
    assert tile_n % 128 == 0

    plane_m, w_aux, w1_fold, w2_fold = _fold_weights(params)

    # Lane-dense homogeneous point layout: [4, B*N], zero-padded to a tile multiple.
    pts_f = points.reshape(total, 3).T                                    # [3, total]
    pts_f = jnp.concatenate([pts_f, jnp.ones((1, total), jnp.float32)], axis=0)  # [4, total]
    total_pad = pl.cdiv(total, tile_n) * tile_n
    if total_pad != total:
        pts_f = jnp.pad(pts_f, ((0, 0), (0, total_pad - total)))
    n_tiles = total_pad // tile_n

    tile_map = lambda i: (0, i)
    const2 = lambda i: (0, 0)
    out_shapes = (
        jax.ShapeDtypeStruct((1, total_pad), jnp.float32),                # dist_one
        jax.ShapeDtypeStruct((P, total_pad), jnp.float32),                # plane_belongs
        jax.ShapeDtypeStruct((P, total_pad), jnp.float32),                # x_proj
        jax.ShapeDtypeStruct((P, total_pad), jnp.float32),                # y_proj
        jax.ShapeDtypeStruct((P, total_pad), jnp.float32),                # distance_to_roi
    )
    in_specs = [
        pl.BlockSpec((4, tile_n), tile_map),                              # points
        pl.BlockSpec((24, 4), const2),                                    # W_aux
        pl.BlockSpec((HID_PAD, 4), const2),                               # fused layer-1
        pl.BlockSpec((16, HID_PAD), const2),                              # fused layer-2
    ]
    out_specs = (
        pl.BlockSpec((1, tile_n), tile_map),
        pl.BlockSpec((P, tile_n), tile_map),
        pl.BlockSpec((P, tile_n), tile_map),
        pl.BlockSpec((P, tile_n), tile_map),
        pl.BlockSpec((P, tile_n), tile_map),
    )

    dist_f, bel_f, xp_f, yp_f, roi_f = pl.pallas_call(
        _base_model1_kernel,
        out_shape=out_shapes,
        grid=(n_tiles,),
        in_specs=in_specs,
        out_specs=out_specs,
        compiler_params=pltpu.CompilerParams(dimension_semantics=("parallel",)),
    )(pts_f, w_aux, w1_fold, w2_fold)

    # Cheap final packing back to the PyTorch output layouts.
    dist_one = dist_f[0, :total].reshape(B, N)
    belongs = bel_f[:, :total].reshape(P, B, N).transpose(1, 2, 0)        # [B, N, P]
    roi = roi_f[:, :total].reshape(P, B, N).transpose(1, 2, 0)            # [B, N, P]
    x_proj = xp_f[:, :total].reshape(P, B, N)
    y_proj = yp_f[:, :total].reshape(P, B, N)
    projection = jnp.stack([x_proj, y_proj], axis=-1).transpose(1, 0, 2, 3)  # [B, P, N, 2]
    return dist_one, belongs, plane_m, projection, roi


# ------------------------------------------------------------------- pure-JAX reference
def reference_forward(points, params):
    """Pure-JAX reference mirroring the PyTorch forward (v_is_mask=True)."""
    P = NUM_PLANE
    plane_m = _compute_plane_m(params)                                    # [1, 3, P]
    dist_all = jnp.abs(jnp.einsum("bnd,dp->bnp", points, plane_m[0]))

    a_e = plane_m[:, 0, :, None]                                          # [1, P, 1]
    b_e = plane_m[:, 1, :, None]
    c_e = plane_m[:, 2, :, None]
    px = points[:, None, :, 0]                                            # [B, 1, N]
    py = points[:, None, :, 1]
    x_proj = b_e * (b_e * px - a_e * py) - a_e * c_e                      # [B, P, N]
    y_proj = a_e * (-b_e * px + a_e * py) - b_e * c_e
    proj = jnp.stack([x_proj, y_proj], axis=-1)                           # [B, P, N, 2]

    rois = []
    for i in range(P):
        h = jnp.maximum(proj[:, i] @ params["roi_w1"][i] + params["roi_b1"][i], 0.0)
        rois.append(h @ params["roi_w2"][i][:, None] + params["roi_b2"][0, i])
    roi = jnp.concatenate(rois, axis=2)                                   # [B, N, P]

    true_dist = jnp.sqrt(roi ** 2 + dist_all ** 2)

    xy = points[:, :, :2]
    h = jnp.maximum(xy @ params["bel_w1"] + params["bel_b1"], 0.0)
    logits = h @ params["bel_w2"] + params["bel_b2"]
    belongs = jax.nn.softmax(logits, axis=2)

    argmax = jnp.argmax(true_dist, axis=2)
    dist_one = jnp.take_along_axis(true_dist, argmax[:, :, None], axis=2)[:, :, 0]
    return dist_one, belongs, plane_m, proj, roi


def make_params(key):
    P, H = NUM_PLANE, HID
    ks = jax.random.split(key, 12)
    u = lambda k, shape, s=0.2: jax.random.uniform(k, shape, jnp.float32, -s, s)
    return {
        "z": jax.random.uniform(ks[0], (1, 128), jnp.float32),            # torch.rand
        "p_w1": u(ks[1], (128, P * H)), "p_b1": u(ks[2], (1, P * H)),
        "p_w2": u(ks[3], (P * H, P * 2)), "p_b2": u(ks[4], (1, P * 2)),
        "roi_w1": u(ks[5], (P, 2, H)), "roi_b1": u(ks[6], (P, H)),
        "roi_w2": u(ks[7], (P, H)), "roi_b2": u(ks[8], (1, P)),
        "bel_w1": u(ks[9], (2, P * H)), "bel_b1": u(ks[10], (1, P * H)),
        "bel_w2": u(ks[11], (P * H, P)), "bel_b2": jnp.zeros((1, P), jnp.float32),
    }


if __name__ == "__main__":
    key = jax.random.PRNGKey(0)
    kp, kx, kz = jax.random.split(key, 3)
    params = make_params(kp)

    B, N = 2, 128
    xy = jax.random.uniform(kx, (B, N, 2), jnp.float32, -1.0, 1.0)
    # non-trivial third coordinate to exercise the exact torch.matmul(points, plane_m) path
    zc = jax.random.uniform(kz, (B, N, 1), jnp.float32, 0.5, 1.5)
    points = jnp.concatenate([xy, zc], axis=-1)                           # [B, N, 3]
    sdfs = jnp.zeros((B, N), jnp.float32)  # unused in forward, kept for interface parity

    # tile_n=128 -> 2 grid steps over the 256 flattened points (exercises the pipeline
    # and keeps >=2 parallel blocks for megacore chips).
    outs = base_model1_forward(points, params, tile_n=128)
    outs = jax.block_until_ready(outs)
    refs = reference_forward(points, params)

    names = ["dist_one", "plane_belongs", "plane_m", "projection", "distance_to_roi"]
    for name, o, r in zip(names, outs, refs):
        assert o.shape == r.shape, (name, o.shape, r.shape)
        np.testing.assert_allclose(np.asarray(o), np.asarray(r), rtol=2e-4, atol=2e-4)

    print("KERNEL_OK")
</pallas_src>

<mosaic_0001>
module attributes {stable_mosaic.version = 11 : i64} {
  func.func @_base_model1_kernel(%arg0: i32, %arg1: memref<4x128xf32, #tpu.memory_space<vmem>>, %arg2: memref<24x4xf32, #tpu.memory_space<vmem>>, %arg3: memref<512x4xf32, #tpu.memory_space<vmem>>, %arg4: memref<16x512xf32, #tpu.memory_space<vmem>>, %arg5: memref<1x128xf32, #tpu.memory_space<vmem>>, %arg6: memref<7x128xf32, #tpu.memory_space<vmem>>, %arg7: memref<7x128xf32, #tpu.memory_space<vmem>>, %arg8: memref<7x128xf32, #tpu.memory_space<vmem>>, %arg9: memref<7x128xf32, #tpu.memory_space<vmem>>) attributes {dimension_semantics = [#tpu.dimension_semantics<parallel>], iteration_bounds = array<i64: 2>, scalar_prefetch = 0 : i64, scratch_operands = 0 : i64, tpu.core_type = #tpu.core_type<tc>, window_params = [{transform_indices = @transform_0, window_bounds = array<i64: 4, 128>}, {pipeline_mode = #tpu.pipeline_mode<synchronous>, transform_indices = @transform_1, window_bounds = array<i64: 24, 4>}, {pipeline_mode = #tpu.pipeline_mode<synchronous>, transform_indices = @transform_2, window_bounds = array<i64: 512, 4>}, {pipeline_mode = #tpu.pipeline_mode<synchronous>, transform_indices = @transform_3, window_bounds = array<i64: 16, 512>}, {transform_indices = @transform_4, window_bounds = array<i64: 1, 128>}, {transform_indices = @transform_5, window_bounds = array<i64: 7, 128>}, {transform_indices = @transform_6, window_bounds = array<i64: 7, 128>}, {transform_indices = @transform_7, window_bounds = array<i64: 7, 128>}, {transform_indices = @transform_8, window_bounds = array<i64: 7, 128>}]} {
    %c0 = arith.constant 0 : index
    %c0_0 = arith.constant 0 : index
    %0 = vector.load %arg1[%c0, %c0_0] : memref<4x128xf32, #tpu.memory_space<vmem>>, vector<4x128xf32>
    %c0_1 = arith.constant 0 : index
    %c0_2 = arith.constant 0 : index
    %1 = vector.load %arg2[%c0_1, %c0_2] : memref<24x4xf32, #tpu.memory_space<vmem>>, vector<24x4xf32>
    %cst = arith.constant dense<0.000000e+00> : vector<24x128xf32>
    %2 = tpu.matmul %1, %0, %cst {dimension_numbers = #tpu.dot_dimension_numbers<[1], [0], [0], [1], [0, 0, 1, 1], [], []>} : vector<24x4xf32>, vector<4x128xf32>, vector<24x128xf32> -> vector<24x128xf32>
    %3 = vector.extract_strided_slice %2 {offsets = [0, 0], sizes = [7, 128], strides = [1, 1]} : vector<24x128xf32> to vector<7x128xf32>
    %4 = vector.extract_strided_slice %2 {offsets = [8, 0], sizes = [7, 128], strides = [1, 1]} : vector<24x128xf32> to vector<7x128xf32>
    %5 = vector.extract_strided_slice %2 {offsets = [16, 0], sizes = [7, 128], strides = [1, 1]} : vector<24x128xf32> to vector<7x128xf32>
    %6 = math.absf %5 : vector<7x128xf32>
    %c0_3 = arith.constant 0 : index
    %c0_4 = arith.constant 0 : index
    %7 = vector.load %arg3[%c0_3, %c0_4] : memref<512x4xf32, #tpu.memory_space<vmem>>, vector<512x4xf32>
    %cst_5 = arith.constant dense<0.000000e+00> : vector<512x128xf32>
    %8 = tpu.matmul %7, %0, %cst_5 {dimension_numbers = #tpu.dot_dimension_numbers<[1], [0], [0], [1], [0, 0, 1, 1], [], []>} : vector<512x4xf32>, vector<4x128xf32>, vector<512x128xf32> -> vector<512x128xf32>
    %cst_6 = arith.constant 0.000000e+00 : f32
    %9 = vector.broadcast %cst_6 : f32 to vector<512x128xf32>
    %10 = arith.maximumf %8, %9 : vector<512x128xf32>
    %c0_7 = arith.constant 0 : index
    %c0_8 = arith.constant 0 : index
    %11 = vector.load %arg4[%c0_7, %c0_8] : memref<16x512xf32, #tpu.memory_space<vmem>>, vector<16x512xf32>
    %cst_9 = arith.constant dense<0.000000e+00> : vector<16x128xf32>
    %12 = tpu.matmul %11, %10, %cst_9 {dimension_numbers = #tpu.dot_dimension_numbers<[1], [0], [0], [1], [0, 0, 1, 1], [], []>} : vector<16x512xf32>, vector<512x128xf32>, vector<16x128xf32> -> vector<16x128xf32>
    %13 = vector.extract_strided_slice %12 {offsets = [0, 0], sizes = [7, 128], strides = [1, 1]} : vector<16x128xf32> to vector<7x128xf32>
    %14 = vector.extract_strided_slice %12 {offsets = [8, 0], sizes = [7, 128], strides = [1, 1]} : vector<16x128xf32> to vector<7x128xf32>
    %15 = arith.mulf %13, %13 : vector<7x128xf32>
    %16 = arith.mulf %6, %6 : vector<7x128xf32>
    %17 = arith.addf %15, %16 : vector<7x128xf32>
    %18 = math.sqrt %17 : vector<7x128xf32>
    %cst_10 = arith.constant dense<0xFF800000> : vector<128xf32>
    %19 = vector.multi_reduction <maximumf>, %18, %cst_10 [0] : vector<7x128xf32> to vector<128xf32>
    %20 = vector.shape_cast %19 : vector<128xf32> to vector<1x128xf32>
    %c0_11 = arith.constant 0 : index
    %c0_12 = arith.constant 0 : index
    %21 = vector.load %arg5[%c0_11, %c0_12] : memref<1x128xf32, #tpu.memory_space<vmem>>, vector<1x128xf32>
    tpu.vector_store %arg5[%c0_11, %c0_12], %20 {strides = array<i32>} : memref<1x128xf32, #tpu.memory_space<vmem>>, vector<1x128xf32>,
    %cst_13 = arith.constant dense<0xFF800000> : vector<128xf32>
    %22 = vector.multi_reduction <maximumf>, %14, %cst_13 [0] : vector<7x128xf32> to vector<128xf32>
    %23 = vector.shape_cast %22 : vector<128xf32> to vector<1x128xf32>
    %24 = vector.broadcast %23 : vector<1x128xf32> to vector<7x128xf32>
    %25 = arith.subf %14, %24 : vector<7x128xf32>
    %26 = math.exp %25 : vector<7x128xf32>
    %cst_14 = arith.constant dense<0.000000e+00> : vector<128xf32>
    %27 = vector.multi_reduction <add>, %26, %cst_14 [0] : vector<7x128xf32> to vector<128xf32>
    %28 = vector.shape_cast %27 : vector<128xf32> to vector<1x128xf32>
    %29 = tpu.reciprocal %28 : vector<1x128xf32> -> vector<1x128xf32>
    %30 = vector.broadcast %29 : vector<1x128xf32> to vector<7x128xf32>
    %31 = arith.mulf %26, %30 : vector<7x128xf32>
    %c0_15 = arith.constant 0 : index
    %c0_16 = arith.constant 0 : index
    %32 = vector.load %arg6[%c0_15, %c0_16] : memref<7x128xf32, #tpu.memory_space<vmem>>, vector<7x128xf32>
    tpu.vector_store %arg6[%c0_15, %c0_16], %31 {strides = array<i32>} : memref<7x128xf32, #tpu.memory_space<vmem>>, vector<7x128xf32>,
    %c0_17 = arith.constant 0 : index
    %c0_18 = arith.constant 0 : index
    %33 = vector.load %arg7[%c0_17, %c0_18] : memref<7x128xf32, #tpu.memory_space<vmem>>, vector<7x128xf32>
    tpu.vector_store %arg7[%c0_17, %c0_18], %3 {strides = array<i32>} : memref<7x128xf32, #tpu.memory_space<vmem>>, vector<7x128xf32>,
    %c0_19 = arith.constant 0 : index
    %c0_20 = arith.constant 0 : index
    %34 = vector.load %arg8[%c0_19, %c0_20] : memref<7x128xf32, #tpu.memory_space<vmem>>, vector<7x128xf32>
    tpu.vector_store %arg8[%c0_19, %c0_20], %4 {strides = array<i32>} : memref<7x128xf32, #tpu.memory_space<vmem>>, vector<7x128xf32>,
    %c0_21 = arith.constant 0 : index
    %c0_22 = arith.constant 0 : index
    %35 = vector.load %arg9[%c0_21, %c0_22] : memref<7x128xf32, #tpu.memory_space<vmem>>, vector<7x128xf32>
    tpu.vector_store %arg9[%c0_21, %c0_22], %13 {strides = array<i32>} : memref<7x128xf32, #tpu.memory_space<vmem>>, vector<7x128xf32>,
    return
  }
  func.func @transform_0(%arg0: i32) -> (i32, i32) {
    %c0_i32 = arith.constant 0 : i32
    %c0_i32_0 = arith.constant 0 : i32
    return %c0_i32, %arg0 : i32, i32
  }
  func.func @transform_1(%arg0: i32) -> (i32, i32) {
    %c0_i32 = arith.constant 0 : i32
    %c0_i32_0 = arith.constant 0 : i32
    %c0_i32_1 = arith.constant 0 : i32
    return %c0_i32, %c0_i32_0 : i32, i32
  }
  func.func @transform_2(%arg0: i32) -> (i32, i32) {
    %c0_i32 = arith.constant 0 : i32
    %c0_i32_0 = arith.constant 0 : i32
    %c0_i32_1 = arith.constant 0 : i32
    return %c0_i32, %c0_i32_0 : i32, i32
  }
  func.func @transform_3(%arg0: i32) -> (i32, i32) {
    %c0_i32 = arith.constant 0 : i32
    %c0_i32_0 = arith.constant 0 : i32
    %c0_i32_1 = arith.constant 0 : i32
    return %c0_i32, %c0_i32_0 : i32, i32
  }
  func.func @transform_4(%arg0: i32) -> (i32, i32) {
    %c0_i32 = arith.constant 0 : i32
    %c0_i32_0 = arith.constant 0 : i32
    return %c0_i32, %arg0 : i32, i32
  }
  func.func @transform_5(%arg0: i32) -> (i32, i32) {
    %c0_i32 = arith.constant 0 : i32
    %c0_i32_0 = arith.constant 0 : i32
    return %c0_i32, %arg0 : i32, i32
  }
  func.func @transform_6(%arg0: i32) -> (i32, i32) {
    %c0_i32 = arith.constant 0 : i32
    %c0_i32_0 = arith.constant 0 : i32
    return %c0_i32, %arg0 : i32, i32
  }
  func.func @transform_7(%arg0: i32) -> (i32, i32) {
    %c0_i32 = arith.constant 0 : i32
    %c0_i32_0 = arith.constant 0 : i32
    return %c0_i32, %arg0 : i32, i32
  }
  func.func @transform_8(%arg0: i32) -> (i32, i32) {
    %c0_i32 = arith.constant 0 : i32
    %c0_i32_0 = arith.constant 0 : i32
    return %c0_i32, %arg0 : i32, i32
  }
}

</mosaic_0001>

<bundles_post_ra>
// kernel: tpu_custom_call.1
= control target key start
LH: loop header
LB: loop body
LE: loop exit
PB: predicated region body
PF: predicated region fallthrough
CT: control target
= control target key end

     0   :  { %s2312_s0 = inlined_call_operand.vmem [shape: f32[4,256], index: 0, kind: input, shape index: {}]   ;;  %s2313_s1 = inlined_call_operand.vmem [shape: f32[24,4], index: 1, kind: input, shape index: {}]   ;;  %s2314_s2 = inlined_call_operand.vmem [shape: f32[512,4], index: 2, kind: input, shape index: {}]   ;;  %s2315_s3 = inlined_call_operand.vmem [shape: f32[16,512], index: 3, kind: input, shape index: {}]   ;;  %s2316_s4 = inlined_call_operand.hbm [shape: f32[1,256], index: 4, kind: output, shape index: {0}]   ;;  %s2317_s5 = inlined_call_operand.hbm [shape: f32[7,256], index: 5, kind: output, shape index: {1}]   ;;  %s2318_s6 = inlined_call_operand.hbm [shape: f32[7,256], index: 6, kind: output, shape index: {2}]   ;;  %s2319_s7 = inlined_call_operand.hbm [shape: f32[7,256], index: 7, kind: output, shape index: {3}]   ;;  %s2320_s8 = inlined_call_operand.hbm [shape: f32[7,256], index: 8, kind: output, shape index: {4}]  }
   0x1   :  { %2323 = sst [smem:[#allocation13_spill]] %s2312_s0 }
   0x2   :  { %2324 = sst [smem:[#allocation14_spill]] %s2313_s1 }
   0x3   :  { %2325 = sst [smem:[#allocation15_spill]] %s2314_s2 }
   0x4   :  { %2326 = sst [smem:[#allocation16_spill]] %s2315_s3 }
   0x5   :  { %14 = vsyncpa [#allocation3], 0 }
   0x6   :  { %16 = vsyncpa [#allocation3 + $0x1], 0 }
   0x7   :  { %17 = vsyncpa [#allocation5], 0 }
   0x8   :  { %19 = vsyncpa [#allocation5 + $0x1], 0 }
   0x9   :  { %20 = vsyncpa [#allocation8], 0 }
   0xa   :  { %22 = vsyncpa [#allocation8 + $0x1], 0  ;;  %s1724_s27 = smov 0   ;;  %s1726_s28 = smov 0  }
   0xb   :  { %s1728_s29 = smov 0   ;;  %s1730_s30 = smov 0  }
   0xc LB: > { %s1745_s9 = sadd.s32 4294967295, %s1677_s30   ;;  %s2321_s10 = sadd.s32 4294967294, %s1677_s30   ;;  %s1677_s30 = sphi %s1730_s30, %s2338_s30   ;;  %s1673_s29 = sphi %s1728_s29, %s2337_s29   ;;  %s1669_s28 = sphi %s1726_s28, %s2336_s28   ;;  %s1665_s27 = sphi %s1724_s27, %s2335_s27  }
   0xd   : > { %s1749_s11 = sadd.s32 1, %s1677_s30   ;;  %s124_s12 = sadd.s32 1, %s1673_s29 }
   0xe   : > { %s121_s13 = ssub.s32 %s1677_s30, %s1749_s11  ;;  %p134_p0 = scmp.ne.s32.totalorder %s1673_s29, %s1669_s28 }
   0xf   : > { %p122_p1 = scmp.eq.s32.totalorder %s121_s13, 0  ;;  %p135_p2 = scmp.eq.s32.totalorder %s1745_s9, 1 }
  0x10   : > { %p140_p3 = scmp.ne.s32.totalorder %s1669_s28, %s1665_s27  ;;  %p141_p4 = scmp.eq.s32.totalorder %s2321_s10, 1 }
  0x11   : > { %s1762_s14 = scalar_select %p122_p1, %s1673_s29, %s124_s12  }
  0x12   : > { %p1764_p5 = por %p135_p2, %p134_p0  ;;  %p1768_p6 = por %p141_p4, %p140_p3 }
  0x13   : > { %p1342_p7 = scmp.ge.s32.totalorder %s1677_s30, 1  ;;  %p279_p8 = scmp.lt.s32.totalorder %s1677_s30, 3 }
  0x15   : > { %p280_p9 = pnand %p1342_p7, %p279_p8 }
  0x16   : > { %p331_p10 = scmp.lt.s32.totalorder (!%p280_p9), %s1745_s9, 1  ;;  %s2329_s0 = sld [smem:[#allocation13_spill]] (!%p280_p9) }
  0x17   : > { %283 = sbr.rel (%p280_p9) target bundleno = 572 (0x23c), region = 36  ;;  %s2330_s1 = sld [smem:[#allocation14_spill]] (!%p280_p9) }
  0x18   : > { %s2331_s2 = sld [smem:[#allocation15_spill]] (!%p280_p9)  ;;  %s2002_s26 = sand.u32 (!%p280_p9), 1, %s1669_s28  }
  0x19   : > { %s2332_s3 = sld [smem:[#allocation16_spill]] (!%p280_p9)  ;;  %s1073_s24 = sand.u32 (!%p280_p9), 1, %s1745_s9  }
  0x1a   : > { %s2191_s25 = sshll.u32 (!%p280_p9), %s1745_s9, 3 }
  0x1b   : > { %s1140_s13 = scalar_lea.hbm (!%p280_p9), %s2319_s7, %s2191_s25 }
  0x1c   : > { %s332_s17 = scalar_select %p331_p10, %s1745_s9, 1  ;;  %vm349_vm0 = vcmask 1043456   ;;  %vm339_vm1 = vcmask 31744  }
  0x1d   : > { %v336_v0 = vld [vmem:[%s2330_s1] sm:$0xff]  ;;  %v337_v5 = vld [vmem:[%s2330_s1 + $0x8] sm:$0xff]  ;;  %v338_v9 = vld [vmem:[%s2330_s1 + $0x10] sm:$0xff]  ;;  %s1515_s1 = scalar_lea.hbm %s2319_s7, 16 }
  0x1e   : > { %s1347_s18 = sshll.u32 %s332_s17, 2  ;;  %v395_v1 = vld [vmem:[%s2331_s2 + $0x78] sm:$0xff]  ;;  %v425_v3 = vld [vmem:[%s2331_s2 + $0x168] sm:$0xff]  ;;  %v416_v4 = vld [vmem:[%s2331_s2 + $0x120] sm:$0xff]  ;;  %s2010_s17 = sshll.u32 %s2002_s26, 3 }
  0x1f   : > { %s334_s21 = scalar_lea.vmem %s2329_s0, %s1347_s18  ;;  %v396_v6 = vld [vmem:[%s2331_s2 + $0x80] sm:$0xff]  ;;  %v426_v7 = vld [vmem:[%s2331_s2 + $0x170] sm:$0xff]  ;;  %v417_v8 = vld [vmem:[%s2331_s2 + $0x128] sm:$0xff]  ;;  %s2322_s22 = scalar_lea.vmem [#allocation6], %s2010_s17 }
  0x20   : > { %v335_v2 = vld [vmem:[%s334_s21] sm:$0xf]  ;;  %v397_v10 = vld [vmem:[%s2331_s2 + $0x88] sm:$0xff]  ;;  %v427_v11 = vld [vmem:[%s2331_s2 + $0x178] sm:$0xff]  ;;  %s323_s19 = scalar_lea.vmem [#allocation7], %s2010_s17  ;;  %s1144_s18 = sshll.u32 %s1140_s13, 4  ;;  %s1145_s18 = int_to_ptr.hbm [resolvable:$true] %s1144_s18 }
  0x21   : > { %1348 = vmatpush.msk.msra.mxu0 %vm349_vm0, %v335_v2  ;;  %1427 = vmatpush.msk.msra.mxu1 %vm349_vm0, %v335_v2  ;;  %v418_v12 = vld [vmem:[%s2331_s2 + $0x130] sm:$0xff]  ;;  %v380_v13 = vld [vmem:[%s2331_s2] sm:$0xff]  ;;  %v419_v16 = vld [vmem:[%s2331_s2 + $0x138] sm:$0xff]  ;;  %s1142_s23 = sshll.u32 %s323_s19, 4  ;;  %s1509_s0 = sshra.s32 %s1145_s18, 4  ;;  %s1143_s23 = int_to_ptr.vmem [resolvable:$true] %s1142_s23  ;;  %s1510_s0 = int_to_ptr.hbm [resolvable:$true] %s1509_s0 }
  0x22   : > { %1349 = vmatmul.msk.f32.vlgmr.msra.gmra.mxu0 %vm339_vm1, %v336_v0  ;;  %1368 = vmatmul.msk.f32.vlgmr.msra.gmra.mxu1 %vm339_vm1, %v395_v1  ;;  %v398_v14 = vld [vmem:[%s2331_s2 + $0x90] sm:$0xff]  ;;  %v428_v15 = vld [vmem:[%s2331_s2 + $0x180] sm:$0xff]  ;;  %v381_v17 = vld [vmem:[%s2331_s2 + $0x8] sm:$0xff]  ;;  %s1511_s20 = scalar_lea.hbm %s1510_s0, 8  ;;  %p1516_p0 = scmp.lt.s32.totalorder %s1510_s0, %s2319_s7 }
  0x23   : > { %1429 = vmatpush.msk.msra.mxu3 %vm349_vm0, %v335_v2  ;;  %1352 = vmatpush.msk.msrb.mxu0 %vm349_vm0, %v335_v2  ;;  %v399_v18 = vld [vmem:[%s2331_s2 + $0x98] sm:$0xff]  ;;  %v429_v19 = vld [vmem:[%s2331_s2 + $0x188] sm:$0xff]  ;;  %v420_v20 = vld [vmem:[%s2331_s2 + $0x140] sm:$0xff]  ;;  %p1512_p11 = scmp.ne.s32.totalorder %s1510_s0, %s1511_s20  ;;  %p1517_p1 = scmp.lt.s32.totalorder %s1515_s1, %s1511_s20 }
  0x24   : > { %1398 = vmatmul.msk.f32.vlgmr.msra.gmra.mxu3 %vm339_vm1, %v425_v3  ;;  %1428 = vmatpush.msk.msra.mxu2 %vm349_vm0, %v335_v2  ;;  %v382_v21 = vld [vmem:[%s2331_s2 + $0x10] sm:$0xff]  ;;  %v400_v22 = vld [vmem:[%s2331_s2 + $0xa0] sm:$0xff]  ;;  %v421_v24 = vld [vmem:[%s2331_s2 + $0x148] sm:$0xff] }
  0x25   : > { %1389 = vmatmul.msk.f32.vlgmr.msra.gmra.mxu2 %vm339_vm1, %v416_v4  ;;  %v430_v23 = vld [vmem:[%s2331_s2 + $0x190] sm:$0xff]  ;;  %v383_v25 = vld [vmem:[%s2331_s2 + $0x18] sm:$0xff]  ;;  %v401_v26 = vld [vmem:[%s2331_s2 + $0xa8] sm:$0xff]  ;;  %p1513_p12 = pnand %p1512_p11, %p1764_p5  ;;  %p1518_p2 = por %p1517_p1, %p1516_p0 }
  0x26   : > { %v431_v27 = vld [vmem:[%s2331_s2 + $0x198] sm:$0xff]  ;;  %v422_v28 = vld [vmem:[%s2331_s2 + $0x150] sm:$0xff]  ;;  %v384_v29 = vld [vmem:[%s2331_s2 + $0x20] sm:$0xff] }
  0x27   : > { %v402_v30 = vld [vmem:[%s2331_s2 + $0xb0] sm:$0xff]  ;;  %v432_v31 = vld [vmem:[%s2331_s2 + $0x1a0] sm:$0xff]  ;;  %v423_v32 = vld [vmem:[%s2331_s2 + $0x158] sm:$0xff]  ;;  %p1514_p13 = pneg %p1513_p12 }
  0x28   : > { %v385_v33 = vld [vmem:[%s2331_s2 + $0x28] sm:$0xff]  ;;  %v403_v34 = vld [vmem:[%s2331_s2 + $0xb8] sm:$0xff]  ;;  %v424_v36 = vld [vmem:[%s2331_s2 + $0x160] sm:$0xff] }
  0x29   : > { %v433_v35 = vld [vmem:[%s2331_s2 + $0x1a8] sm:$0xff]  ;;  %v386_v37 = vld [vmem:[%s2331_s2 + $0x30] sm:$0xff]  ;;  %v404_v38 = vld [vmem:[%s2331_s2 + $0xc0] sm:$0xff]  ;;  %p1519_p3 = pnand %p1518_p2, %p1514_p13 }
  0x2a   : > { %1350 = vmatmul.msk.f32.gmra.mxu0 %vm339_vm1, %v337_v5  ;;  %1369 = vmatmul.msk.f32.gmra.mxu1 %vm339_vm1, %v396_v6  ;;  %v434_v39 = vld [vmem:[%s2331_s2 + $0x1b0] sm:$0xff]  ;;  %v387_v40 = vld [vmem:[%s2331_s2 + $0x38] sm:$0xff]  ;;  %v405_v41 = vld [vmem:[%s2331_s2 + $0xc8] sm:$0xff] }
  0x2b   : > { %v435_v42 = vld [vmem:[%s2331_s2 + $0x1b8] sm:$0xff]  ;;  %v388_v43 = vld [vmem:[%s2331_s2 + $0x40] sm:$0xff]  ;;  %v406_v44 = vld [vmem:[%s2331_s2 + $0xd0] sm:$0xff] }
  0x2c   : > { %1399 = vmatmul.msk.f32.gmra.mxu3 %vm339_vm1, %v426_v7  ;;  %v436_v45 = vld [vmem:[%s2331_s2 + $0x1c0] sm:$0xff]  ;;  %v389_v46 = vld [vmem:[%s2331_s2 + $0x48] sm:$0xff]  ;;  %v407_v47 = vld [vmem:[%s2331_s2 + $0xd8] sm:$0xff] }
  0x2d   : > { %1390 = vmatmul.msk.f32.gmra.mxu2 %vm339_vm1, %v417_v8  ;;  %v437_v48 = vld [vmem:[%s2331_s2 + $0x1c8] sm:$0xff]  ;;  %v390_v49 = vld [vmem:[%s2331_s2 + $0x50] sm:$0xff]  ;;  %v408_v50 = vld [vmem:[%s2331_s2 + $0xe0] sm:$0xff] }
  0x2e   : > { %v438_v51 = vld [vmem:[%s2331_s2 + $0x1d0] sm:$0xff]  ;;  %v391_v52 = vld [vmem:[%s2331_s2 + $0x58] sm:$0xff]  ;;  %v409_v53 = vld [vmem:[%s2331_s2 + $0xe8] sm:$0xff] }
  0x2f   : > { %v439_v54 = vld [vmem:[%s2331_s2 + $0x1d8] sm:$0xff]  ;;  %v392_v55 = vld [vmem:[%s2331_s2 + $0x60] sm:$0xff]  ;;  %v410_v56 = vld [vmem:[%s2331_s2 + $0xf0] sm:$0xff] }
  0x30   : > { %v440_v57 = vld [vmem:[%s2331_s2 + $0x1e0] sm:$0xff]  ;;  %v393_v60 = vld [vmem:[%s2331_s2 + $0x68] sm:$0xff]  ;;  %v411_v61 = vld [vmem:[%s2331_s2 + $0xf8] sm:$0xff] }
  0x31   : > { %v441_v63 = vld [vmem:[%s2331_s2 + $0x1e8] sm:$0xff]  ;;  %v394_v2 = vld [vmem:[%s2331_s2 + $0x70] sm:$0xff]  ;;  %v412_v3 = vld [vmem:[%s2331_s2 + $0x100] sm:$0xff] }
  0x32   : > { %1351 = vmatmul.msk.f32.gmra.mxu0 %vm339_vm1, %v338_v9  ;;  %1370 = vmatmul.msk.f32.gmra.mxu1 %vm339_vm1, %v397_v10  ;;  %v442_v6 = vld [vmem:[%s2331_s2 + $0x1f0] sm:$0xff]  ;;  %v413_v9 = vld [vmem:[%s2331_s2 + $0x108] sm:$0xff] }
  0x34   : > { %1400 = vmatmul.msk.f32.gmra.mxu3 %vm339_vm1, %v427_v11 }
  0x35   : > { %1391 = vmatmul.msk.f32.gmra.mxu2 %vm339_vm1, %v418_v12  ;;  %v443_v12 = vld [vmem:[%s2331_s2 + $0x1f8] sm:$0xff] }
  0x3a   : > { %1353 = vmatmul.msk.f32.vlgmr.msrb.gmra.mxu0 %vm339_vm1, %v380_v13  ;;  %1371 = vmatmul.msk.f32.gmra.mxu1 %vm339_vm1, %v398_v14 }
  0x3c   : > { %1401 = vmatmul.msk.f32.gmra.mxu3 %vm339_vm1, %v428_v15  ;;  %v414_v15 = vld [vmem:[%s2331_s2 + $0x110] sm:$0xff] }
  0x3d   : > { %1392 = vmatmul.msk.f32.gmra.mxu2 %vm339_vm1, %v419_v16 }
  0x42   : > { %1354 = vmatmul.msk.f32.gmra.mxu0 %vm339_vm1, %v381_v17  ;;  %1372 = vmatmul.msk.f32.gmra.mxu1 %vm339_vm1, %v399_v18 }
  0x44   : > { %1402 = vmatmul.msk.f32.gmra.mxu3 %vm339_vm1, %v429_v19 }
  0x45   : > { %1393 = vmatmul.msk.f32.gmra.mxu2 %vm339_vm1, %v420_v20 }
  0x4a   : > { %1355 = vmatmul.msk.f32.gmra.mxu0 %vm339_vm1, %v382_v21  ;;  %1373 = vmatmul.msk.f32.gmra.mxu1 %vm339_vm1, %v400_v22 }
  0x4c   : > { %1403 = vmatmul.msk.f32.gmra.mxu3 %vm339_vm1, %v430_v23  ;;  %v415_v23 = vld [vmem:[%s2331_s2 + $0x118] sm:$0xff] }
  0x4d   : > { %1394 = vmatmul.msk.f32.gmra.mxu2 %vm339_vm1, %v421_v24 }
  0x52   : > { %1356 = vmatmul.msk.f32.gmra.mxu0 %vm339_vm1, %v383_v25  ;;  %1374 = vmatmul.msk.f32.gmra.mxu1 %vm339_vm1, %v401_v26 }
  0x54   : > { %1404 = vmatmul.msk.f32.gmra.mxu3 %vm339_vm1, %v431_v27 }
  0x55   : > { %1395 = vmatmul.msk.f32.gmra.mxu2 %vm339_vm1, %v422_v28 }
  0x5a   : > { %1357 = vmatmul.msk.f32.gmra.mxu0 %vm339_vm1, %v384_v29  ;;  %1375 = vmatmul.msk.f32.gmra.mxu1 %vm339_vm1, %v402_v30 }
  0x5c   : > { %1405 = vmatmul.msk.f32.gmra.mxu3 %vm339_vm1, %v432_v31 }
  0x5d   : > { %1396 = vmatmul.msk.f32.gmra.mxu2 %vm339_vm1, %v423_v32 }
  0x62   : > { %1358 = vmatmul.msk.f32.gmra.mxu0 %vm339_vm1, %v385_v33  ;;  %1376 = vmatmul.msk.f32.gmra.mxu1 %vm339_vm1, %v403_v34 }
  0x64   : > { %1406 = vmatmul.msk.f32.gmra.mxu3 %vm339_vm1, %v433_v35 }
  0x65   : > { %1397 = vmatmul.msk.f32.gmra.mxu2 %vm339_vm1, %v424_v36 }
  0x6a   : > { %1359 = vmatmul.msk.f32.gmra.mxu0 %vm339_vm1, %v386_v37  ;;  %1377 = vmatmul.msk.f32.gmra.mxu1 %vm339_vm1, %v404_v38 }
  0x6c   : > { %1407 = vmatmul.msk.f32.gmra.mxu3 %vm339_vm1, %v434_v39 }
  0x72   : > { %1360 = vmatmul.msk.f32.gmra.mxu0 %vm339_vm1, %v387_v40  ;;  %1378 = vmatmul.msk.f32.gmra.mxu1 %vm339_vm1, %v405_v41 }
  0x74   : > { %1408 = vmatmul.msk.f32.gmra.mxu3 %vm339_vm1, %v435_v42 }
  0x7a   : > { %1361 = vmatmul.msk.f32.gmra.mxu0 %vm339_vm1, %v388_v43  ;;  %1379 = vmatmul.msk.f32.gmra.mxu1 %vm339_vm1, %v406_v44 }
  0x7c   : > { %1409 = vmatmul.msk.f32.gmra.mxu3 %vm339_vm1, %v436_v45 }
  0x82   : > { %1362 = vmatmul.msk.f32.gmra.mxu0 %vm339_vm1, %v389_v46  ;;  %1380 = vmatmul.msk.f32.gmra.mxu1 %vm339_vm1, %v407_v47 }
  0x84   : > { %1410 = vmatmul.msk.f32.gmra.mxu3 %vm339_vm1, %v437_v48 }
  0x8a   : > { %1363 = vmatmul.msk.f32.gmra.mxu0 %vm339_vm1, %v390_v49  ;;  %1381 = vmatmul.msk.f32.gmra.mxu1 %vm339_vm1, %v408_v50 }
  0x8c   : > { %1411 = vmatmul.msk.f32.gmra.mxu3 %vm339_vm1, %v438_v51 }
  0x92   : > { %1364 = vmatmul.msk.f32.gmra.mxu0 %vm339_vm1, %v391_v52  ;;  %1382 = vmatmul.msk.f32.gmra.mxu1 %vm339_vm1, %v409_v53 }
  0x94   : > { %1412 = vmatmul.msk.f32.gmra.mxu3 %vm339_vm1, %v439_v54 }
  0x9a   : > { %1365 = vmatmul.msk.f32.gmra.mxu0 %vm339_vm1, %v392_v55  ;;  %1383 = vmatmul.msk.f32.gmra.mxu1 %vm339_vm1, %v410_v56 }
  0x9c   : > { %1413 = vmatmul.msk.f32.gmra.mxu3 %vm339_vm1, %v440_v57 }
  0x9f   : > { %v370_v58 = vpop.f32.mrf.mxu0  ;;  %v698_v59 = vpop.f32.mrf.mxu1 }
  0xa0   : > { %1066 = vst [vmem:[%s2322_s22] sm:$0x7f] %v370_v58  ;;  %v860_v62 = vmax.f32 %v698_v59, 0.0  ;;  %s2199_s22 = scalar_lea.sflag [#allocation8], %s1073_s24 }
  0xa2   : > { %1366 = vmatmul.msk.f32.gmra.mxu0 %vm339_vm1, %v393_v60  ;;  %1384 = vmatmul.msk.f32.gmra.mxu1 %vm339_vm1, %v411_v61 }
  0xa3   : > { %917 = vmatpush.msrb.mxu2 %v860_v62 }
  0xa4   : > { %1414 = vmatmul.msk.f32.gmra.mxu3 %vm339_vm1, %v441_v63 }
  0xa7   : > { %v373_v0 = vpop.f32.mrf.mxu0  ;;  %v2028_v1 = vpop.f32.mrf.mxu1 }
  0xa8   : > { %1067 = vst [vmem:[%s323_s19] sm:$0x7f] %v373_v0  ;;  %v788_v4 = vpop.f32.mrf.mxu3  ;;  %v2039_v5 = vpop.f32.mrf.mxu2 }
  0xa9   : > { %v890_v20 = vmax.f32 %v788_v4, 0.0  ;;  %v881_v57 = vmax.f32 %v2039_v5, 0.0 }
  0xaa   : > { %1367 = vmatmul.msk.f32.gmra.mxu0 %vm339_vm1, %v394_v2  ;;  %1385 = vmatmul.msk.f32.gmra.mxu1 %vm339_vm1, %v412_v3 }
  0xac   : > { %1415 = vmatmul.msk.f32.gmra.mxu3 %vm339_vm1, %v442_v6 }
  0xaf   : > { %v2047_v7 = vpop.f32.mrf.mxu0  ;;  %v2049_v8 = vpop.f32.mrf.mxu1 }
  0xb0   : > { %v791_v10 = vpop.f32.mrf.mxu3  ;;  %v2054_v11 = vpop.f32.mrf.mxu2 }
  0xb1   : > { %v891_v18 = vmax.f32 %v791_v10, 0.0  ;;  %v882_v56 = vmax.f32 %v2054_v11, 0.0 }
  0xb2   : > { %1386 = vmatmul.msk.f32.gmra.mxu1 %vm339_vm1, %v413_v9 }
  0xb4   : > { %1416 = vmatmul.msk.f32.gmra.mxu3 %vm339_vm1, %v443_v12 }
  0xb7   : > { %v2061_v13 = vpop.f32.mrf.mxu0  ;;  %v2063_v14 = vpop.f32.mrf.mxu1 }
  0xb8   : > { %v794_v16 = vpop.f32.mrf.mxu3  ;;  %v767_v17 = vpop.f32.mrf.mxu2 }
  0xb9   : > { %v892_v19 = vmax.f32 %v794_v16, 0.0  ;;  %v883_v55 = vmax.f32 %v767_v17, 0.0 }
  0xba   : > { %1387 = vmatmul.msk.f32.gmra.mxu1 %vm339_vm1, %v414_v15 }
  0xbb   : > { %963 = vmatpush.msra.mxu0 %v892_v19 }
  0xbd   : > { %964 = vmatpush.msra.mxu0 %v891_v18 }
  0xbf   : > { %v2069_v21 = vpop.f32.mrf.mxu0  ;;  %v2071_v22 = vpop.f32.mrf.mxu1  ;;  %965 = vmatpush.msra.mxu0 %v890_v20 }
  0xc0   : > { %v2076_v24 = vpop.f32.mrf.mxu3  ;;  %v770_v25 = vpop.f32.mrf.mxu2 }
  0xc1   : > { %v884_v54 = vmax.f32 %v770_v25, 0.0 }
  0xc2   : > { %1388 = vmatmul.msk.f32.gmra.mxu1 %vm339_vm1, %v415_v23 }
  0xc7   : > { %v2079_v26 = vpop.f32.mrf.mxu0  ;;  %v2081_v27 = vpop.f32.mrf.mxu1 }
  0xc8   : > { %v2083_v28 = vpop.f32.mrf.mxu3  ;;  %v773_v29 = vpop.f32.mrf.mxu2 }
  0xc9   : > { %v885_v50 = vmax.f32 %v773_v29, 0.0 }
  0xcf   : > { %v2085_v30 = vpop.f32.mrf.mxu0  ;;  %v2087_v31 = vpop.f32.mrf.mxu1 }
  0xd0   : > { %v2089_v32 = vpop.f32.mrf.mxu3  ;;  %v776_v33 = vpop.f32.mrf.mxu2 }
  0xd1   : > { %v886_v49 = vmax.f32 %v776_v33, 0.0 }
  0xd7   : > { %v2091_v34 = vpop.f32.mrf.mxu0  ;;  %v2093_v35 = vpop.f32.mrf.mxu1 }
  0xd8   : > { %v2095_v36 = vpop.f32.mrf.mxu3  ;;  %v779_v37 = vpop.f32.mrf.mxu2 }
  0xd9   : > { %v887_v48 = vmax.f32 %v779_v37, 0.0 }
  0xdf   : > { %v2097_v38 = vpop.f32.mrf.mxu0  ;;  %v2099_v39 = vpop.f32.mrf.mxu1 }
  0xe0   : > { %v2101_v40 = vpop.f32.mrf.mxu3  ;;  %v782_v41 = vpop.f32.mrf.mxu2 }
  0xe1   : > { %v888_v46 = vmax.f32 %v782_v41, 0.0 }
  0xe7   : > { %v2103_v42 = vpop.f32.mrf.mxu0  ;;  %v2105_v43 = vpop.f32.mrf.mxu1 }
  0xe8   : > { %v2107_v44 = vpop.f32.mrf.mxu3  ;;  %v785_v45 = vpop.f32.mrf.mxu2 }
  0xe9   : > { %v889_v47 = vmax.f32 %v785_v45, 0.0 }
  0xeb   : > { %966 = vmatpush.msra.mxu0 %v889_v47 }
  0xed   : > { %967 = vmatpush.msra.mxu0 %v888_v46 }
  0xef   : > { %v2109_v51 = vpop.f32.mrf.mxu0  ;;  %v728_v52 = vpop.f32.mrf.mxu1  ;;  %968 = vmatpush.msra.mxu0 %v887_v48  ;;  %v869_v48 = vmax.f32 %v2105_v43, 0.0  ;;  %v865_v43 = vmax.f32 %v2081_v27, 0.0  ;;  %v862_v27 = vmax.f32 %v2049_v8, 0.0 }
  0xf0   : > { %v2111_v53 = vpop.f32.mrf.mxu3  ;;  %v870_v45 = vmax.f32 %v728_v52, 0.0  ;;  %v866_v52 = vmax.f32 %v2087_v31, 0.0  ;;  %v850_v31 = vmax.f32 %v2097_v38, 0.0  ;;  %v847_v38 = vmax.f32 %v2079_v26, 0.0  ;;  %v909_v26 = vld [vmem:[%s2332_s3] sm:$0xff] }
  0xf1   : > { %969 = vmatpush.msra.mxu0 %v886_v49 }
  0xf3   : > { %970 = vmatpush.msra.mxu0 %v885_v50 }
  0xf5   : > { %971 = vmatpush.msra.mxu0 %v884_v54  ;;  %v868_v54 = vmax.f32 %v2099_v39, 0.0 }
  0xf7   : > { %v677_v58 = vpop.f32.mrf.mxu0  ;;  %v731_v59 = vpop.f32.mrf.mxu1  ;;  %972 = vmatpush.msra.mxu0 %v883_v55 }
  0xf8   : > { %v2115_v60 = vpop.f32.mrf.mxu3  ;;  %v871_v37 = vmax.f32 %v731_v59, 0.0  ;;  %v853_v59 = vmax.f32 %v677_v58, 0.0  ;;  %v861_v58 = vmax.f32 %v2028_v1, 0.0 }
  0xf9   : > { %973 = vmatpush.msra.mxu0 %v882_v56  ;;  %v867_v56 = vmax.f32 %v2093_v35, 0.0  ;;  %v851_v35 = vmax.f32 %v2103_v42, 0.0 }
  0xfb   : > { %974 = vmatpush.msra.mxu0 %v881_v57 }
  0xff   : > { %v680_v61 = vpop.f32.mrf.mxu0  ;;  %v734_v62 = vpop.f32.mrf.mxu1 }
 0x100   : > { %v2117_v63 = vpop.f32.mrf.mxu3  ;;  %v872_v29 = vmax.f32 %v734_v62, 0.0  ;;  %v854_v57 = vmax.f32 %v680_v61, 0.0  ;;  %v852_v62 = vmax.f32 %v2109_v51, 0.0  ;;  %v863_v61 = vmax.f32 %v2063_v14, 0.0  ;;  %v910_v14 = vld [vmem:[%s2332_s3 + $0x8] sm:$0xff] }
 0x101   : > { %v849_v51 = vmax.f32 %v2091_v34, 0.0 }
 0x107   : > { %v683_v0 = vpop.f32.mrf.mxu0  ;;  %v737_v2 = vpop.f32.mrf.mxu1 }
 0x108   : > { %v2119_v3 = vpop.f32.mrf.mxu3  ;;  %v873_v20 = vmax.f32 %v737_v2, 0.0  ;;  %v855_v55 = vmax.f32 %v683_v0, 0.0  ;;  %v864_v2 = vmax.f32 %v2071_v22, 0.0  ;;  %v848_v22 = vmax.f32 %v2085_v30, 0.0 }
 0x10f   : > { %v686_v4 = vpop.f32.mrf.mxu0  ;;  %v740_v6 = vpop.f32.mrf.mxu1 }
 0x110   : > { %v2121_v9 = vpop.f32.mrf.mxu3  ;;  %v874_v18 = vmax.f32 %v740_v6, 0.0  ;;  %v856_v49 = vmax.f32 %v686_v4, 0.0  ;;  %v846_v6 = vmax.f32 %v2069_v21, 0.0  ;;  %v911_v21 = vld [vmem:[%s2332_s3 + $0x10] sm:$0xff] }
 0x117   : > { %v689_v5 = vpop.f32.mrf.mxu0  ;;  %v743_v10 = vpop.f32.mrf.mxu1 }
 0x118   : > { %v2123_v11 = vpop.f32.mrf.mxu3  ;;  %v875_v16 = vmax.f32 %v743_v10, 0.0  ;;  %v857_v46 = vmax.f32 %v689_v5, 0.0  ;;  %v845_v5 = vmax.f32 %v2061_v13, 0.0  ;;  %v914_v13 = vld [vmem:[%s2332_s3 + $0x28] sm:$0xff] }
 0x11f   : > { %v692_v12 = vpop.f32.mrf.mxu0  ;;  %v746_v15 = vpop.f32.mrf.mxu1 }
 0x120   : > { %v876_v17 = vmax.f32 %v746_v15, 0.0  ;;  %v2125_v19 = vpop.f32.mrf.mxu3  ;;  %v858_v41 = vmax.f32 %v692_v12, 0.0 }
 0x122   : > { %940 = vmatpush.msrb.mxu3 %v876_v17  ;;  %v904_v17 = vmax.f32 %v2123_v11, 0.0  ;;  %v900_v11 = vmax.f32 %v2115_v60, 0.0  ;;  %v894_v60 = vmax.f32 %v2083_v28, 0.0 }
 0x124   : > { %941 = vmatpush.msrb.mxu3 %v875_v16  ;;  %v905_v16 = vmax.f32 %v2125_v19, 0.0  ;;  %v901_v19 = vmax.f32 %v2117_v63, 0.0  ;;  %v895_v63 = vmax.f32 %v2089_v32, 0.0 }
 0x126   : > { %942 = vmatpush.msrb.mxu3 %v874_v18  ;;  %v913_v18 = vld [vmem:[%s2332_s3 + $0x20] sm:$0xff] }
 0x127   : > { %v695_v23 = vpop.f32.mrf.mxu0  ;;  %v2127_v25 = vpop.f32.mrf.mxu1 }
 0x128   : > { %v859_v33 = vmax.f32 %v695_v23, 0.0  ;;  %943 = vmatpush.msrb.mxu3 %v873_v20  ;;  %v2129_v47 = vpop.f32.mrf.mxu3  ;;  %v877_v10 = vmax.f32 %v2127_v25, 0.0  ;;  %v915_v20 = vld [vmem:[%s2332_s3 + $0x30] sm:$0xff]  ;;  %v903_v23 = vmax.f32 %v2121_v9, 0.0  ;;  %v902_v25 = vmax.f32 %v2119_v3, 0.0 }
 0x129   : > { %v906_v15 = vmax.f32 %v2129_v47, 0.0  ;;  %v897_v9 = vmax.f32 %v2101_v40, 0.0  ;;  %v896_v3 = vmax.f32 %v2095_v36, 0.0  ;;  %v912_v40 = vld [vmem:[%s2332_s3 + $0x18] sm:$0xff] }
 0x12a   : > { %918 = vmatpush.msrb.mxu2 %v859_v33  ;;  %944 = vmatpush.msrb.mxu3 %v872_v29  ;;  %v899_v29 = vmax.f32 %v2111_v53, 0.0  ;;  %v898_v33 = vmax.f32 %v2107_v44, 0.0  ;;  %v893_v53 = vmax.f32 %v2076_v24, 0.0  ;;  %v916_v36 = vld [vmem:[%s2332_s3 + $0x38] sm:$0xff] }
 0x12c   : > { %919 = vmatpush.msrb.mxu2 %v858_v41  ;;  %945 = vmatpush.msrb.mxu3 %v871_v37 }
 0x12e   : > { %920 = vmatpush.msrb.mxu2 %v857_v46  ;;  %946 = vmatpush.msrb.mxu3 %v870_v45 }
 0x12f   : > { %v752_v50 = vpop.f32.mrf.mxu1 }
 0x130   : > { %921 = vmatpush.msrb.mxu2 %v856_v49  ;;  %947 = vmatpush.msrb.mxu3 %v869_v48  ;;  %v839_v39 = vpop.f32.mrf.mxu3  ;;  %v878_v1 = vmax.f32 %v752_v50, 0.0 }
 0x131   : > { %v907_v12 = vmax.f32 %v839_v39, 0.0 }
 0x132   : > { %922 = vmatpush.msrb.mxu2 %v855_v55  ;;  %948 = vmatpush.msrb.mxu3 %v868_v54 }
 0x134   : > { %923 = vmatpush.msrb.mxu2 %v854_v57  ;;  %949 = vmatpush.msrb.mxu3 %v867_v56 }
 0x136   : > { %924 = vmatpush.msrb.mxu2 %v853_v59  ;;  %950 = vmatpush.msrb.mxu3 %v866_v52 }
 0x137   : > { %v755_v0 = vpop.f32.mrf.mxu1 }
 0x138   : > { %925 = vmatpush.msrb.mxu2 %v852_v62  ;;  %951 = vmatpush.msrb.mxu3 %v865_v43  ;;  %v842_v8 = vpop.f32.mrf.mxu3  ;;  %v879_v4 = vmax.f32 %v755_v0, 0.0 }
 0x139   : > { %v908_v30 = vmax.f32 %v842_v8, 0.0 }
 0x13a   : > { %926 = vmatpush.msrb.mxu2 %v851_v35  ;;  %952 = vmatpush.msrb.mxu3 %v864_v2 }
 0x13c   : > { %927 = vmatpush.msrb.mxu2 %v850_v31  ;;  %953 = vmatpush.msrb.mxu3 %v863_v61 }
 0x13e   : > { %928 = vmatpush.msrb.mxu2 %v849_v51  ;;  %954 = vmatpush.msrb.mxu3 %v862_v27 }
 0x13f   : > { %v758_v42 = vpop.f32.mrf.mxu1 }
 0x140   : > { %929 = vmatpush.msrb.mxu2 %v848_v22  ;;  %955 = vmatpush.msrb.mxu3 %v861_v58  ;;  %v880_v34 = vmax.f32 %v758_v42, 0.0 }
 0x141   : > { %956 = vmatmul.f32.vlgmr.msrb.gmra.mxu3 %v910_v14 }
 0x142   : > { %930 = vmatpush.msrb.mxu2 %v847_v38  ;;  %975 = vmatpush.msra.mxu0 %v880_v34 }
 0x144   : > { %931 = vmatpush.msrb.mxu2 %v846_v6  ;;  %976 = vmatpush.msra.mxu0 %v879_v4 }
 0x146   : > { %932 = vmatpush.msrb.mxu2 %v845_v5  ;;  %977 = vmatpush.msra.mxu0 %v878_v1 }
 0x147   : > { %933 = vmatmul.f32.vlgmr.msrb.gmra.mxu2 %v909_v26 }
 0x148   : > { %986 = vmatpush.msra.mxu2 %v908_v30  ;;  %978 = vmatpush.msra.mxu0 %v877_v10 }
 0x149   : > { %979 = vmatmul.f32.vlgmr.msra.gmra.mxu0 %v911_v21  ;;  %959 = vmatmul.f32.gmra.mxu3 %v914_v13 }
 0x14a   : > { %987 = vmatpush.msra.mxu2 %v907_v12 }
 0x14c   : > { %988 = vmatpush.msra.mxu2 %v906_v15 }
 0x14e   : > { %989 = vmatpush.msra.mxu2 %v905_v16 }
 0x14f   : > { %936 = vmatmul.f32.gmra.mxu2 %v913_v18 }
 0x150   : > { %990 = vmatpush.msra.mxu2 %v904_v17 }
 0x151   : > { %982 = vmatmul.f32.gmra.mxu0 %v915_v20 }
 0x152   : > { %991 = vmatpush.msra.mxu2 %v903_v23 }
 0x154   : > { %992 = vmatpush.msra.mxu2 %v902_v25 }
 0x156   : > { %993 = vmatpush.msra.mxu2 %v901_v19 }
 0x158   : > { %994 = vmatpush.msra.mxu2 %v900_v11 }
 0x15a   : > { %995 = vmatpush.msra.mxu2 %v899_v29 }
 0x15c   : > { %996 = vmatpush.msra.mxu2 %v898_v33 }
 0x15e   : > { %997 = vmatpush.msra.mxu2 %v897_v9 }
 0x160   : > { %998 = vmatpush.msra.mxu2 %v896_v3 }
 0x162   : > { %999 = vmatpush.msra.mxu2 %v895_v63 }
 0x164   : > { %1000 = vmatpush.msra.mxu2 %v894_v60 }
 0x166   : > { %1001 = vmatpush.msra.mxu2 %v893_v53 }
 0x167   : > { %1002 = vmatmul.f32.vlgmr.msra.gmra.mxu2 %v912_v40 }
 0x16f   : > { %1005 = vmatmul.f32.gmra.mxu2 %v916_v36 }
 0x170   : > { %1522 = shalt.err (!%p1519_p3)
}
 0x171   : > { %1433 = dma.vmem_to_hbm [thread:$0]  (%p1764_p5), %s1143_s23, 128, %s1145_s18, %s2199_s22   ;;  %v379_v41 = vand.u32 2147483647, %v2047_v7 }
 0x172   : > { %s1154_s2 = scalar_lea.hbm %s2320_s8, %s2191_s25  ;;  %s330_s0 = scalar_lea.vmem [#allocation9], %s2010_s17 }
 0x173   : > { %s1156_s1 = sshll.u32 %s330_s0, 4  ;;  %s1158_s3 = sshll.u32 %s1154_s2, 4  ;;  %v1010_v49 = vmul.f32 %v379_v41, %v379_v41  ;;  %s1157_s1 = int_to_ptr.vmem [resolvable:$true] %s1156_s1  ;;  %s1159_s3 = int_to_ptr.hbm [resolvable:$true] %s1158_s3 }
 0x174   : > { %s1537_s23 = sshra.s32 %s1159_s3, 4  ;;  %s1543_s19 = scalar_lea.hbm %s2320_s8, 16  ;;  %s1538_s23 = int_to_ptr.hbm [resolvable:$true] %s1537_s23 }
 0x175   : > { %s1539_s13 = scalar_lea.hbm %s1538_s23, 8  ;;  %p1544_p9 = scmp.lt.s32.totalorder %s1538_s23, %s2320_s8 }
 0x176   : > { %p1540_p4 = scmp.ne.s32.totalorder %s1538_s23, %s1539_s13  ;;  %p1545_p10 = scmp.lt.s32.totalorder %s1543_s19, %s1539_s13 }
 0x178   : > { %p1541_p7 = pnand %p1540_p4, %p1764_p5  ;;  %p1546_p11 = por %p1545_p10, %p1544_p9 }
 0x17a   : > { %p1542_p8 = pneg %p1541_p7 }
 0x17c   : > { %p1547_p12 = pnand %p1546_p11, %p1542_p8 }
 0x1c4   : > { %v957_v32 = vpop.f32.mrf.mxu3 }
 0x1c6   : > { %v980_v44 = vpop.f32.mrf.mxu0 }
 0x1ca   : > { %v934_v24 = vpop.f32.mrf.mxu2 }
 0x1cb   : > { %v958_v37 = vadd.f32 %v957_v32, %v934_v24 }
 0x1cc   : > { %v960_v47 = vpop.f32.mrf.mxu3 }
 0x1cd   : > { %v981_v45 = vadd.f32 %v980_v44, %v958_v37 }
 0x1ce   : > { %v983_v55 = vpop.f32.mrf.mxu0 }
 0x1d2   : > { %v937_v28 = vpop.f32.mrf.mxu2 }
 0x1d3   : > { %v961_v54 = vadd.f32 %v960_v47, %v937_v28 }
 0x1ea   : > { %v1003_v46 = vpop.f32.mrf.mxu2 }
 0x1eb   : > { %v1004_v48 = vadd.f32 %v1003_v46, %v981_v45 }
 0x1ed   : > { %v1009_v50 = vmul.f32 %v1004_v48, %v1004_v48  ;;  %1068 = vst [vmem:[%s330_s0] sm:$0x7f] %v1004_v48 }
 0x1ee   : > { %1550 = shalt.err (!%p1547_p12)
}
 0x1ef   : > { %1434 = dma.vmem_to_hbm [thread:$0]  (%p1764_p5), %s1157_s1, 128, %s1159_s3, %s2199_s22   ;;  %v1011_v7 = vadd.f32 %v1010_v49, %v1009_v50  ;;  %v984_v56 = vadd.f32 %v983_v55, %v961_v54  ;;  %vm1024_vm2 = vcmask 1046528  }
 0x1f0   : > { %s1098_s2 = scalar_lea.hbm %s2316_s4, %s1745_s9  ;;  %s302_s0 = scalar_lea.vmem [#allocation2], %s2002_s26 }
 0x1f1   : > { %1489 = vrsqrt.f32 %v1011_v7  ;;  %vm1019_vm3 = vcmp.eq.f32.partialorder %v1011_v7, inf  ;;  %v1022_v38 = vand.u32 2147483648, %v1011_v7  ;;  %vm1021_vm4 = vcmp.eq.f32.partialorder %v1011_v7, 0.0  ;;  %s1100_s1 = sshll.u32 %s302_s0, 4  ;;  %s1102_s3 = sshll.u32 %s1098_s2, 4  ;;  %s1101_s1 = int_to_ptr.vmem [resolvable:$true] %s1100_s1  ;;  %s1103_s3 = int_to_ptr.hbm [resolvable:$true] %s1102_s3 }
 0x1f2   : > { %v1006_v57 = vpop.f32.mrf.mxu2  ;;  %s1070_s23 = scalar_lea.sflag [#allocation3], %s2002_s26  ;;  %s1565_s13 = sshra.s32 %s1103_s3, 4  ;;  %s1566_s13 = int_to_ptr.hbm [resolvable:$true] %s1565_s13 }
 0x1f3   : > { %v1007_v52 = vadd.f32 %v1006_v57, %v984_v56  ;;  %s1567_s18 = scalar_lea.hbm %s1566_s13, 1  ;;  %s1571_s21 = scalar_lea.hbm %s2316_s4, 2 }
 0x1f4   : > { %p1568_p13 = scmp.ne.s32.totalorder %s1566_s13, %s1567_s18  ;;  %p1572_p2 = scmp.lt.s32.totalorder %s1566_s13, %s2316_s4 }
 0x1f5   : > { %v1033_v59 = vsel %vm1024_vm2, %v1007_v52, -inf  ;;  %p1573_p3 = scmp.lt.s32.totalorder %s1571_s21, %s1567_s18 }
 0x1f6   : > { %v1034_v43 = vrot.slane %v1033_v59, 4  ;;  %p1569_p0 = pnand %p1568_p13, %p1764_p5 }
 0x1f7   : > { %v1490_v62 = vpop.eup %1489  ;;  %p1574_p4 = por %p1573_p3, %p1572_p2 }
 0x1f8   : > { %v1013_v39 = vmul.f32 %v1490_v62, %v1011_v7  ;;  %v1035_v0 = vmax.f32 %v1033_v59, %v1034_v43  ;;  %p1570_p1 = pneg %p1569_p0 }
 0x1fa   : > { %v1014_v2 = vmul.f32 %v1490_v62, %v1013_v39  ;;  %v1036_v35 = vrot.slane %v1035_v0, 2  ;;  %p1575_p7 = pnand %p1574_p4, %p1570_p1 }
 0x1fc   : > { %v1015_v61 = vmul.f32 0.5, %v1014_v2  ;;  %v1037_v31 = vmax.f32 %v1035_v0, %v1036_v35 }
 0x1fe   : > { %v1016_v27 = vsub.f32 1.5, %v1015_v61  ;;  %v1038_v51 = vrot.slane %v1037_v31, 1 }
 0x200   : > { %v1017_v58 = vmul.f32 %v1490_v62, %v1016_v27  ;;  %v1039_v22 = vmax.f32 %v1037_v31, %v1038_v51 }
 0x202   : > { %v1018_v14 = vmul.f32 %v1017_v58, %v1011_v7  ;;  %v1040_v42 = vsub.f32 %v1007_v52, %v1039_v22 }
 0x204   : > { %v1020_v8 = vsel %vm1019_vm3, %v1011_v7, %v1018_v14  ;;  %v1041_v4 = vmul.f32 1.442695, %v1040_v42 }
 0x205   : > { %v1023_v34 = vsel %vm1021_vm4, %v1022_v38, %v1020_v8 }
 0x206   : > { %v1025_v6 = vsel %vm1024_vm2, %v1023_v34, -inf  ;;  %1491 = vpow2.f32 %v1041_v4 }
 0x207   : > { %v1026_v1 = vrot.slane %v1025_v6, 4 }
 0x209   : > { %v1027_v30 = vmax.f32 %v1025_v6, %v1026_v1 }
 0x20b   : > { %v1028_v5 = vrot.slane %v1027_v30, 2 }
 0x20c   : > { %v1492_v10 = vpop.eup %1491 }
 0x20d   : > { %v1043_v26 = vsel %vm1024_vm2, %v1492_v10, 0.0  ;;  %v1029_v21 = vmax.f32 %v1027_v30, %v1028_v5 }
 0x20e   : > { %v1044_v12 = vrot.slane %v1043_v26, 4 }
 0x20f   : > { %v1030_v13 = vrot.slane %v1029_v21, 1 }
 0x210   : > { %v1045_v15 = vadd.f32 %v1044_v12, %v1043_v26 }
 0x211   : > { %v1031_v16 = vmax.f32 %v1029_v21, %v1030_v13 }
 0x212   : > { %v1046_v17 = vrot.slane %v1045_v15, 2 }
 0x213   : > { %1032 = vst [vmem:[%s302_s0] sm:$0x1] %v1031_v16 }
 0x214   : > { %v1047_v18 = vadd.f32 %v1046_v17, %v1045_v15 }
 0x215   : > { %1578 = shalt.err (!%p1575_p7)
}
 0x216   : > { %1430 = dma.vmem_to_hbm [thread:$0]  (%p1764_p5), %s1101_s1, 16, %s1103_s3, %s1070_s23   ;;  %v1048_v20 = vrot.slane %v1047_v18, 1 }
 0x217   : > { %s1112_s2 = scalar_lea.hbm %s2317_s5, %s2191_s25  ;;  %s1126_s1 = scalar_lea.hbm %s2318_s6, %s2191_s25 }
 0x218   : > { %v1049_v23 = vadd.f32 %v1048_v20, %v1047_v18  ;;  %s309_s3 = scalar_lea.vmem [#allocation4], %s2010_s17  ;;  %s1116_s18 = sshll.u32 %s1112_s2, 4  ;;  %s1117_s18 = int_to_ptr.hbm [resolvable:$true] %s1116_s18 }
 0x219   : > { %s1114_s23 = sshll.u32 %s309_s3, 4  ;;  %s2333_s20 = scalar_lea.vmem [#allocation6], %s2010_s17  ;;  %s1115_s23 = int_to_ptr.vmem [resolvable:$true] %s1114_s23 }
 0x21a   : > { %1493 = vrcp.f32 %v1049_v23  ;;  %v1061_v29 = vand.u32 2147483648, %v1049_v23  ;;  %v1059_v9 = vand.u32 2147483647, %v1049_v23  ;;  %vm1055_vm6 = vweird.f32 %v1049_v23  ;;  %s2259_s19 = sshll.u32 %s2333_s20, 4  ;;  %s2261_s21 = sshll.u32 %s1126_s1, 4  ;;  %s1129_s19 = int_to_ptr.vmem [resolvable:$true] %s2259_s19  ;;  %s1131_s21 = int_to_ptr.hbm [resolvable:$true] %s2261_s21 }
 0x21b   : > { %s1074_s25 = scalar_lea.sflag [#allocation5], %s1073_s24  ;;  %s1593_s10 = sshra.s32 %s1117_s18, 4  ;;  %s1594_s10 = int_to_ptr.hbm [resolvable:$true] %s1593_s10 }
 0x21c   : > { %v1062_v63 = vor.u32 1.1754944e-38, %v1061_v29  ;;  %vm1060_vm8 = vcmp.eq.f32.partialorder %v1059_v9, 8.507059e+37  ;;  %s1595_s17 = scalar_lea.hbm %s1594_s10, 8  ;;  %s1599_s12 = scalar_lea.hbm %s2317_s5, 16 }
 0x21d   : > { %p1596_p8 = scmp.ne.s32.totalorder %s1594_s10, %s1595_s17  ;;  %p1600_p11 = scmp.lt.s32.totalorder %s1594_s10, %s2317_s5 }
 0x21e   : > { %p1601_p12 = scmp.lt.s32.totalorder %s1599_s12, %s1595_s17 }
 0x21f   : > { %p1597_p9 = pnand %p1596_p8, %p1764_p5 }
 0x220   : > { %v1494_v25 = vpop.eup %1493  ;;  %p1602_p13 = por %p1601_p12, %p1600_p11 }
 0x221   : > { %v1051_v19 = vmul.f32 %v1494_v25, %v1049_v23  ;;  %vm1056_vm5 = vweird.f32 %v1494_v25  ;;  %p1598_p10 = pneg %p1597_p9 }
 0x222   : > { %vm1057_vm7 = vmor %vm1055_vm6, %vm1056_vm5 }
 0x223   : > { %v1052_v11 = vsub.f32 1.0, %v1051_v19  ;;  %p1603_p0 = pnand %p1602_p13, %p1598_p10 }
 0x225   : > { %v1053_v33 = vmul.f32 %v1494_v25, %v1052_v11 }
 0x227   : > { %v1054_v3 = vadd.f32 %v1494_v25, %v1053_v33 }
 0x229   : > { %v1058_v60 = vsel %vm1057_vm7, %v1494_v25, %v1054_v3 }
 0x22a   : > { %v1063_v53 = vsel %vm1060_vm8, %v1062_v63, %v1058_v60 }
 0x22b   : > { %v1064_v40 = vmul.f32 %v1492_v10, %v1063_v53 }
 0x22d   : > { %1065 = vst [vmem:[%s309_s3] sm:$0x7f] %v1064_v40 }
 0x22e   : > { %1606 = shalt.err (!%p1603_p0)
}
 0x22f   : > { %1431 = dma.vmem_to_hbm [thread:$0]  (%p1764_p5), %s1115_s23, 128, %s1117_s18, %s1074_s25  }
 0x230   : > { %s1621_s9 = sshra.s32 %s1131_s21, 4  ;;  %s1627_s3 = scalar_lea.hbm %s2318_s6, 16  ;;  %s1622_s9 = int_to_ptr.hbm [resolvable:$true] %s1621_s9 }
 0x231   : > { %s1623_s24 = scalar_lea.hbm %s1622_s9, 8  ;;  %p1628_p4 = scmp.lt.s32.totalorder %s1622_s9, %s2318_s6 }
 0x232   : > { %p1624_p1 = scmp.ne.s32.totalorder %s1622_s9, %s1623_s24  ;;  %p1629_p7 = scmp.lt.s32.totalorder %s1627_s3, %s1623_s24 }
 0x234   : > { %p1625_p2 = pnand %p1624_p1, %p1764_p5  ;;  %p1630_p8 = por %p1629_p7, %p1628_p4 }
 0x236   : > { %p1626_p3 = pneg %p1625_p2 }
 0x238   : > { %p1631_p9 = pnand %p1630_p8, %p1626_p3 }
 0x23a   : > { %1634 = shalt.err (!%p1631_p9)
}
 0x23b   : > { %1432 = dma.vmem_to_hbm [thread:$0]  (%p1764_p5), %s1129_s19, 128, %s1131_s21, %s1074_s25  }
 0x23c PF: > { %p1456_p10 = scmp.ge.s32.totalorder %s1677_s30, 2  ;;  %s1170_s23 = sand.u32 1, %s1665_s27  }
 0x23d   : > { %s1171_s18 = scalar_lea.sflag [#allocation3], %s1170_s23 }
 0x23e   : > { %p1441_p11 = pnand %p1456_p10, %p1768_p6 }
 0x240   : > { %p1442_p12 = pneg %p1441_p11 }
 0x242   : > { %1652 = dma.done.wait (%p1442_p12), %s1171_s18, 16  }
 0x243   : > { %1654 = vsyncadd (%p1442_p12), %s1171_s18, 4294967280  ;;  %s2334_s17 = sadd.s32 4294967294, %s1677_s30  }
 0x244   : > { %s1179_s15 = sand.u32 1, %s2334_s17  }
 0x245   : > { %s1180_s22 = scalar_lea.sflag [#allocation5], %s1179_s15 }
 0x246   : > { %1656 = dma.done.wait (%p1442_p12), %s1180_s22, 256  }
 0x247   : > { %1658 = vsyncadd (%p1442_p12), %s1180_s22, 4294967040  ;;  %s1200_s26 = scalar_lea.sflag [#allocation8], %s1179_s15 }
 0x248   : > { %1660 = dma.done.wait (%p1442_p12), %s1200_s26, 256  }
 0x249   : > { %1662 = vsyncadd (%p1442_p12), %s1200_s26, 4294967040  ;;  %p25_p5 = scmp.ge.s32.totalorder %s1749_s11, 4   ;;  %s2335_s27 = smov %s1669_s28 }
 0x24a   : > { %s2336_s28 = smov %s1673_s29  ;;  %s2337_s29 = smov %s1762_s14 }
 0x24b   : > { %s2338_s30 = smov %s1749_s11  ;;  %27 = sbr.rel (!%p25_p5) target bundleno = 12 (0xc), region = 135 }
 0x250   :  { %1216 = vsyncpa [#allocation3], 1 }
 0x251   :  { %1218 = vsyncpa [#allocation3 + $0x1], 1 }
 0x252   :  { %1219 = vsyncpa [#allocation5], 1 }
 0x253   :  { %1221 = vsyncpa [#allocation5 + $0x1], 1 }
 0x254   :  { %1222 = vsyncpa [#allocation8], 1 }
 0x255   :  { %1224 = vsyncpa [#allocation8 + $0x1], 1 }

</bundles_post_ra>
